<compile_context>
chip_gen: v6e
topology: v6e:2x2x1
jax: 0.10.0
libtpu: 0.0.40
codegen_flags: <defaults>
</compile_context>

<pallas_src>
import functools

import jax
import jax.numpy as jnp
from jax.experimental import pallas as pl
from jax.experimental.pallas import tpu as pltpu


# ----------------------------- helpers --------------------------------------

def _round_up(x, m):
    return ((x + m - 1) // m) * m


def _pad2(x, rows, cols):
    r, c = x.shape
    return jnp.pad(x, ((0, rows - r), (0, cols - c)))


# --------------------------- GCN layer kernel --------------------------------

def _gcn_layer_kernel(a_ref, dinv_row_ref, dinv_col_ref, x_ref, w_ref, b_ref,
                      o_ref, acc_ref):
    """One GCNConv layer, tiled over (row tile i, reduction tile k):

        acc[i] += (A+I)[i, k] @ (dinv[k] * (x[k] @ W))        (bf16 MXU, f32 acc)
        o[i]    = dinv[i] * acc[i] + b                        (on last k step)

    A_hat = D^{-1/2}(A + I)D^{-1/2} is applied as f32 rank-1 row/col scales
    around the raw bf16 (A + I) matmul, never materialized.
    """
    k = pl.program_id(1)

    @pl.when(k == 0)
    def _():
        acc_ref[...] = jnp.zeros_like(acc_ref)

    # xw: (TK, Cout) f32; x / W are bf16, accumulate in f32 on the MXU.
    xw = jnp.dot(x_ref[...], w_ref[...], preferred_element_type=jnp.float32)
    xw = (dinv_col_ref[...] * xw).astype(jnp.bfloat16)
    acc_ref[...] += jnp.dot(a_ref[...], xw, preferred_element_type=jnp.float32)

    @pl.when(k == pl.num_programs(1) - 1)
    def _():
        o_ref[...] = dinv_row_ref[...] * acc_ref[...] + b_ref[...]


def _gcn_layer(a_bf, dinv, x_bf, w_bf, b, *, tm, tk):
    n_pad = a_bf.shape[0]
    cin_p = x_bf.shape[1]
    cout_p = w_bf.shape[1]
    row_tiles = n_pad // tm
    k_tiles = n_pad // tk

    flops = 2 * row_tiles * n_pad * cin_p * cout_p + 2 * n_pad * n_pad * cout_p
    bytes_accessed = (2 * n_pad * n_pad + 2 * n_pad * cin_p + 2 * cin_p * cout_p
                      + 4 * 2 * n_pad + 4 * cout_p + 4 * n_pad * cout_p)

    return pl.pallas_call(
        _gcn_layer_kernel,
        out_shape=jax.ShapeDtypeStruct((n_pad, cout_p), jnp.float32),
        grid_spec=pltpu.PrefetchScalarGridSpec(
            num_scalar_prefetch=0,
            grid=(row_tiles, k_tiles),
            in_specs=[
                pl.BlockSpec((tm, tk), lambda i, k: (i, k)),         # (A+I) tile, bf16
                pl.BlockSpec((tm, 1), lambda i, k: (i, 0)),          # dinv row scale
                pl.BlockSpec((tk, 1), lambda i, k: (k, 0)),          # dinv col scale
                pl.BlockSpec((tk, cin_p), lambda i, k: (k, 0)),      # x rows, bf16
                pl.BlockSpec((cin_p, cout_p), lambda i, k: (0, 0)),  # W, bf16
                pl.BlockSpec((1, cout_p), lambda i, k: (0, 0)),      # bias, f32
            ],
            out_specs=pl.BlockSpec((tm, cout_p), lambda i, k: (i, 0)),
            scratch_shapes=[pltpu.VMEM((tm, cout_p), jnp.float32)],
        ),
        compiler_params=pltpu.CompilerParams(
            dimension_semantics=("parallel", "arbitrary"),
            vmem_limit_bytes=48 * 1024 * 1024,   # fits v7x's 64 MiB with headroom
        ),
        cost_estimate=pl.CostEstimate(flops=int(flops), transcendentals=0,
                                      bytes_accessed=int(bytes_accessed)),
    )(a_bf, dinv, dinv, x_bf, w_bf, b)


# --------------------------- edge scoring kernel ------------------------------

def _edge_score_kernel(src_ref, dst_ref, h_ref, o_ref, hs_ref, hd_ref, *,
                       apply_sigmoid):
    """Per edge tile: score[e] = sigmoid(h[src[e], :] . h[dst[e], :]).

    src/dst are scalar-prefetched SMEM vectors; h rows are gathered with
    dynamic sublane slices into VMEM scratch (no one-hot selection matmuls).
    """
    te = hs_ref.shape[0]
    base = pl.program_id(0) * te

    def gather(e, carry):
        s = src_ref[base + e]
        d = dst_ref[base + e]
        hs_ref[pl.ds(e, 1), :] = h_ref[pl.ds(s, 1), :]
        hd_ref[pl.ds(e, 1), :] = h_ref[pl.ds(d, 1), :]
        return carry

    jax.lax.fori_loop(0, te, gather, 0, unroll=False)

    prod = hs_ref[...] * hd_ref[...]                       # (TE, C) f32, VPU
    # Channel reduction emitted lane-dense as a (1, TE) row.
    # TODO(synk): for very large E, fold this reduction into the gather loop /
    # VPU-XLU instead of an M=1 MXU op (negligible at TE=128).
    ones_c = jnp.ones((1, prod.shape[1]), jnp.float32)
    score = jax.lax.dot_general(ones_c, prod, (((1,), (1,)), ((), ())),
                                preferred_element_type=jnp.float32)
    if apply_sigmoid:
        score = jax.nn.sigmoid(score)
    o_ref[...] = score


def _edge_scores(src_p, dst_p, h2, *, apply_sigmoid, te):
    e_pad = src_p.shape[0]
    n_pad, c_p = h2.shape
    kernel = functools.partial(_edge_score_kernel, apply_sigmoid=apply_sigmoid)

    flops = 3 * e_pad * c_p
    bytes_accessed = 4 * n_pad * c_p + 2 * 4 * e_pad + 4 * e_pad

    return pl.pallas_call(
        kernel,
        out_shape=jax.ShapeDtypeStruct((1, e_pad), jnp.float32),
        grid_spec=pltpu.PrefetchScalarGridSpec(
            num_scalar_prefetch=2,                 # src, dst -> SMEM
            grid=(e_pad // te,),
            in_specs=[pl.BlockSpec((n_pad, c_p), lambda i, s, d: (0, 0))],
            out_specs=pl.BlockSpec((1, te), lambda i, s, d: (0, i)),
            scratch_shapes=[pltpu.VMEM((te, c_p), jnp.float32),
                            pltpu.VMEM((te, c_p), jnp.float32)],
        ),
        compiler_params=pltpu.CompilerParams(
            dimension_semantics=("parallel",),
            vmem_limit_bytes=48 * 1024 * 1024,
        ),
        cost_estimate=pl.CostEstimate(
            flops=int(flops),
            transcendentals=int(e_pad if apply_sigmoid else 0),
            bytes_accessed=int(bytes_accessed)),
    )(src_p, dst_p, h2)


# ------------------------------- wrapper -------------------------------------

def decoder_forward(params, z, edge_index, sigmoid=True):
    n, cin = z.shape
    e = edge_index.shape[1]
    c1 = params["w1"].shape[1]
    c2 = params["w2"].shape[1]

    # Lane-dense padding (zeros are inert given dinv==0 on padded nodes).
    n_pad = max(_round_up(n, 128), 128)
    e_pad = max(_round_up(e, 128), 128)
    cin_pad = max(_round_up(cin, 128), 128)
    c1_pad = max(_round_up(c1, 128), 128)
    c2_pad = max(_round_up(c2, 128), 128)

    # MXU-shaped tiles per generation: 256 rows when divisible (v6e/v7x), else 128 (v5e).
    tm = 256 if n_pad % 256 == 0 else 128
    tk = 256 if n_pad % 256 == 0 else 128
    te = 128

    src = edge_index[0].astype(jnp.int32)
    dst = edge_index[1].astype(jnp.int32)

    # Dense A + I with PyG gcn_norm semantics (src -> dst messages, duplicate
    # edges accumulate, self loops added), built directly at padded size.
    # bf16 is exact for these small-integer entries.
    a = jnp.zeros((n_pad, n_pad), jnp.float32).at[dst, src].add(1.0)
    diag = jnp.arange(n, dtype=jnp.int32)
    a = a.at[diag, diag].add(1.0)
    deg = jnp.sum(a, axis=1)
    dinv = jnp.where(deg > 0.0, jax.lax.rsqrt(deg), 0.0)[:, None]   # (n_pad, 1) f32
    a_bf = a.astype(jnp.bfloat16)

    z_bf = _pad2(z.astype(jnp.float32), n_pad, cin_pad).astype(jnp.bfloat16)
    w1_bf = _pad2(params["w1"], cin_pad, c1_pad).astype(jnp.bfloat16)
    w2_bf = _pad2(params["w2"], c1_pad, c2_pad).astype(jnp.bfloat16)
    b1_p = _pad2(params["b1"], 1, c1_pad)
    b2_p = _pad2(params["b2"], 1, c2_pad)

    # Two GCNConv layers (row-tiled, streamed A, bf16 MXU / f32 accumulation).
    h1 = _gcn_layer(a_bf, dinv, z_bf, w1_bf, b1_p, tm=tm, tk=tk)
    h2 = _gcn_layer(a_bf, dinv, h1.astype(jnp.bfloat16), w2_bf, b2_p, tm=tm, tk=tk)

    # Edge endpoints, scalar-prefetched to SMEM (padded edges point at node 0
    # and are sliced off below).
    src_p = jnp.zeros((e_pad,), jnp.int32).at[:e].set(src)
    dst_p = jnp.zeros((e_pad,), jnp.int32).at[:e].set(dst)

    scores = _edge_scores(src_p, dst_p, h2, apply_sigmoid=bool(sigmoid), te=te)
    return scores[0, :e]


# ------------------------------ parameters -----------------------------------

def init_decoder_params(key, in_channels, hidden_channels, out_channels):
    """Glorot-uniform init (GCNConv default); zero biases."""
    k1, k2 = jax.random.split(key)

    def glorot(k, fan_in, fan_out):
        lim = jnp.sqrt(6.0 / (fan_in + fan_out))
        return jax.random.uniform(k, (fan_in, fan_out), jnp.float32, -lim, lim)

    return {
        "w1": glorot(k1, in_channels, hidden_channels),
        "b1": jnp.zeros((1, hidden_channels), jnp.float32),
        "w2": glorot(k2, hidden_channels, out_channels),
        "b2": jnp.zeros((1, out_channels), jnp.float32),
    }


# ----------------------------- reference check -------------------------------

def decoder_reference(params, z, edge_index, sigmoid=True):
    n = z.shape[0]
    src = edge_index[0]
    dst = edge_index[1]
    a = jnp.zeros((n, n), jnp.float32).at[dst, src].add(1.0)
    a = a + jnp.eye(n, dtype=jnp.float32)
    deg = jnp.sum(a, axis=1)
    dinv = jnp.where(deg > 0.0, jax.lax.rsqrt(deg), 0.0)
    a_hat = dinv[:, None] * a * dinv[None, :]
    h = a_hat @ (z @ params["w1"]) + params["b1"]
    h = a_hat @ (h @ params["w2"]) + params["b2"]
    val = jnp.sum(h[edge_index[0]] * h[edge_index[1]], axis=-1)
    return jax.nn.sigmoid(val) if sigmoid else val


# ---------------------------------- main --------------------------------------

if __name__ == "__main__":
    key = jax.random.PRNGKey(0)
    kz, ksrc, kdst, kparam = jax.random.split(key, 4)

    N = 8                    # number of graph nodes
    E = 16                   # number of edges
    in_channels = 16         # latent dim (Decoder in_channels=16)
    hidden_channels = 32     # "data.num_features" stand-in
    out_channels = 32

    z = jax.random.normal(kz, (N, in_channels), jnp.float32)
    src = jax.random.randint(ksrc, (E,), 0, N)
    dst = jax.random.randint(kdst, (E,), 0, N)
    edge_index = jnp.stack([src, dst]).astype(jnp.int32)   # (2, E)

    params = init_decoder_params(kparam, in_channels, hidden_channels, out_channels)

    out = jax.block_until_ready(decoder_forward(params, z, edge_index, sigmoid=True))
    ref = decoder_reference(params, z, edge_index, sigmoid=True)
    assert out.shape == (E,)
    # bf16 MXU operands (f32 accumulation) -> relaxed tolerance vs f32 reference.
    assert jnp.allclose(out, ref, atol=2e-2, rtol=2e-2)

    out_raw = jax.block_until_ready(decoder_forward(params, z, edge_index, sigmoid=False))
    ref_raw = decoder_reference(params, z, edge_index, sigmoid=False)
    assert jnp.allclose(out_raw, ref_raw, atol=7e-2, rtol=7e-2)

    print("KERNEL_OK")
</pallas_src>

<mosaic_0001>
module attributes {stable_mosaic.version = 11 : i64} {
  func.func @_gcn_layer_kernel(%arg0: i32, %arg1: i32, %arg2: memref<128x128xbf16, #tpu.memory_space<vmem>>, %arg3: memref<128x1xf32, #tpu.memory_space<vmem>>, %arg4: memref<128x1xf32, #tpu.memory_space<vmem>>, %arg5: memref<128x128xbf16, #tpu.memory_space<vmem>>, %arg6: memref<128x128xbf16, #tpu.memory_space<vmem>>, %arg7: memref<1x128xf32, #tpu.memory_space<vmem>>, %arg8: memref<128x128xf32, #tpu.memory_space<vmem>>, %arg9: memref<128x128xf32, #tpu.memory_space<vmem>>) attributes {dimension_semantics = [#tpu.dimension_semantics<parallel>, #tpu.dimension_semantics<arbitrary>], iteration_bounds = array<i64: 1, 1>, scalar_prefetch = 0 : i64, scratch_operands = 1 : i64, tpu.core_type = #tpu.core_type<tc>, window_params = [{transform_indices = @transform_0, window_bounds = array<i64: 128, 128>}, {transform_indices = @transform_1, window_bounds = array<i64: 128, 1>}, {transform_indices = @transform_2, window_bounds = array<i64: 128, 1>}, {transform_indices = @transform_3, window_bounds = array<i64: 128, 128>}, {pipeline_mode = #tpu.pipeline_mode<synchronous>, transform_indices = @transform_4, window_bounds = array<i64: 128, 128>}, {pipeline_mode = #tpu.pipeline_mode<synchronous>, transform_indices = @transform_5, window_bounds = array<i64: 1, 128>}, {transform_indices = @transform_6, window_bounds = array<i64: 128, 128>}]} {
    %c0_i32 = arith.constant 0 : i32
    %0 = arith.cmpi eq, %arg1, %c0_i32 : i32
    %1 = arith.extui %0 : i1 to i32
    %c0_i32_0 = arith.constant 0 : i32
    %2 = arith.cmpi ne, %1, %c0_i32_0 : i32
    scf.if %2 {
      %cst_15 = arith.constant 0.000000e+00 : f32
      %18 = vector.broadcast %cst_15 : f32 to vector<128x128xf32>
      %c0_16 = arith.constant 0 : index
      %c0_17 = arith.constant 0 : index
      %19 = vector.load %arg9[%c0_16, %c0_17] : memref<128x128xf32, #tpu.memory_space<vmem>>, vector<128x128xf32>
      tpu.vector_store %arg9[%c0_16, %c0_17], %18 {strides = array<i32>} : memref<128x128xf32, #tpu.memory_space<vmem>>, vector<128x128xf32>,
    } else {
    }
    %c0 = arith.constant 0 : index
    %c0_1 = arith.constant 0 : index
    %3 = vector.load %arg5[%c0, %c0_1] : memref<128x128xbf16, #tpu.memory_space<vmem>>, vector<128x128xbf16>
    %c0_2 = arith.constant 0 : index
    %c0_3 = arith.constant 0 : index
    %4 = vector.load %arg6[%c0_2, %c0_3] : memref<128x128xbf16, #tpu.memory_space<vmem>>, vector<128x128xbf16>
    %cst = arith.constant dense<0.000000e+00> : vector<128x128xf32>
    %5 = tpu.matmul %3, %4, %cst {dimension_numbers = #tpu.dot_dimension_numbers<[1], [0], [0], [1], [0, 0, 1, 1], [], []>} : vector<128x128xbf16>, vector<128x128xbf16>, vector<128x128xf32> -> vector<128x128xf32>
    %c0_4 = arith.constant 0 : index
    %c0_5 = arith.constant 0 : index
    %6 = vector.load %arg4[%c0_4, %c0_5] : memref<128x1xf32, #tpu.memory_space<vmem>>, vector<128x1xf32>
    %7 = vector.broadcast %6 : vector<128x1xf32> to vector<128x128xf32>
    %8 = arith.mulf %7, %5 : vector<128x128xf32>
    %9 = arith.truncf %8 : vector<128x128xf32> to vector<128x128xbf16>
    %c0_6 = arith.constant 0 : index
    %c0_7 = arith.constant 0 : index
    %10 = vector.load %arg9[%c0_6, %c0_7] : memref<128x128xf32, #tpu.memory_space<vmem>>, vector<128x128xf32>
    %c0_8 = arith.constant 0 : index
    %c0_9 = arith.constant 0 : index
    %11 = vector.load %arg2[%c0_8, %c0_9] : memref<128x128xbf16, #tpu.memory_space<vmem>>, vector<128x128xbf16>
    %cst_10 = arith.constant dense<0.000000e+00> : vector<128x128xf32>
    %12 = tpu.matmul %11, %9, %cst_10 {dimension_numbers = #tpu.dot_dimension_numbers<[1], [0], [0], [1], [0, 0, 1, 1], [], []>} : vector<128x128xbf16>, vector<128x128xbf16>, vector<128x128xf32> -> vector<128x128xf32>
    %13 = arith.addf %10, %12 : vector<128x128xf32>
    %c0_11 = arith.constant 0 : index
    %c0_12 = arith.constant 0 : index
    %14 = vector.load %arg9[%c0_11, %c0_12] : memref<128x128xf32, #tpu.memory_space<vmem>>, vector<128x128xf32>
    tpu.vector_store %arg9[%c0_11, %c0_12], %13 {strides = array<i32>} : memref<128x128xf32, #tpu.memory_space<vmem>>, vector<128x128xf32>,
    %c0_i32_13 = arith.constant 0 : i32
    %15 = arith.cmpi eq, %arg1, %c0_i32_13 : i32
    %16 = arith.extui %15 : i1 to i32
    %c0_i32_14 = arith.constant 0 : i32
    %17 = arith.cmpi ne, %16, %c0_i32_14 : i32
    scf.if %17 {
      %c0_15 = arith.constant 0 : index
      %c0_16 = arith.constant 0 : index
      %18 = vector.load %arg3[%c0_15, %c0_16] : memref<128x1xf32, #tpu.memory_space<vmem>>, vector<128x1xf32>
      %c0_17 = arith.constant 0 : index
      %c0_18 = arith.constant 0 : index
      %19 = vector.load %arg9[%c0_17, %c0_18] : memref<128x128xf32, #tpu.memory_space<vmem>>, vector<128x128xf32>
      %20 = vector.broadcast %18 : vector<128x1xf32> to vector<128x128xf32>
      %21 = arith.mulf %20, %19 : vector<128x128xf32>
      %c0_19 = arith.constant 0 : index
      %c0_20 = arith.constant 0 : index
      %22 = vector.load %arg7[%c0_19, %c0_20] : memref<1x128xf32, #tpu.memory_space<vmem>>, vector<1x128xf32>
      %23 = vector.broadcast %22 : vector<1x128xf32> to vector<128x128xf32>
      %24 = arith.addf %21, %23 : vector<128x128xf32>
      %c0_21 = arith.constant 0 : index
      %c0_22 = arith.constant 0 : index
      %25 = vector.load %arg8[%c0_21, %c0_22] : memref<128x128xf32, #tpu.memory_space<vmem>>, vector<128x128xf32>
      tpu.vector_store %arg8[%c0_21, %c0_22], %24 {strides = array<i32>} : memref<128x128xf32, #tpu.memory_space<vmem>>, vector<128x128xf32>,
    } else {
    }
    return
  }
  func.func @transform_0(%arg0: i32, %arg1: i32) -> (i32, i32) {
    %c0_i32 = arith.constant 0 : i32
    return %arg0, %arg1 : i32, i32
  }
  func.func @transform_1(%arg0: i32, %arg1: i32) -> (i32, i32) {
    %c0_i32 = arith.constant 0 : i32
    %c0_i32_0 = arith.constant 0 : i32
    return %arg0, %c0_i32 : i32, i32
  }
  func.func @transform_2(%arg0: i32, %arg1: i32) -> (i32, i32) {
    %c0_i32 = arith.constant 0 : i32
    %c0_i32_0 = arith.constant 0 : i32
    return %arg1, %c0_i32 : i32, i32
  }
  func.func @transform_3(%arg0: i32, %arg1: i32) -> (i32, i32) {
    %c0_i32 = arith.constant 0 : i32
    %c0_i32_0 = arith.constant 0 : i32
    return %arg1, %c0_i32 : i32, i32
  }
  func.func @transform_4(%arg0: i32, %arg1: i32) -> (i32, i32) {
    %c0_i32 = arith.constant 0 : i32
    %c0_i32_0 = arith.constant 0 : i32
    %c0_i32_1 = arith.constant 0 : i32
    return %c0_i32, %c0_i32_0 : i32, i32
  }
  func.func @transform_5(%arg0: i32, %arg1: i32) -> (i32, i32) {
    %c0_i32 = arith.constant 0 : i32
    %c0_i32_0 = arith.constant 0 : i32
    %c0_i32_1 = arith.constant 0 : i32
    return %c0_i32, %c0_i32_0 : i32, i32
  }
  func.func @transform_6(%arg0: i32, %arg1: i32) -> (i32, i32) {
    %c0_i32 = arith.constant 0 : i32
    %c0_i32_0 = arith.constant 0 : i32
    return %arg0, %c0_i32 : i32, i32
  }
}

</mosaic_0001>

<bundles_post_ra>
// kernel: tpu_custom_call.1
= control target key start
LH: loop header
LB: loop body
LE: loop exit
PB: predicated region body
PF: predicated region fallthrough
CT: control target
= control target key end

     0   :  { %v958_v2 = vmov 0   ;;  %s1192_s0 = inlined_call_operand.vmem [shape: bf16[128,128], index: 0, kind: input, shape index: {}]   ;;  %s1193_s1 = inlined_call_operand.vmem [shape: f32[128,1], index: 1, kind: input, shape index: {}]   ;;  %s1194_s2 = inlined_call_operand.vmem [shape: f32[128,1], index: 2, kind: input, shape index: {}]   ;;  %s1195_s3 = inlined_call_operand.vmem [shape: bf16[128,128], index: 3, kind: input, shape index: {}]   ;;  %s1196_s4 = inlined_call_operand.vmem [shape: bf16[128,128], index: 4, kind: input, shape index: {}]   ;;  %s1197_s5 = inlined_call_operand.vmem [shape: f32[1,128], index: 5, kind: input, shape index: {}]   ;;  %s1198_s6 = inlined_call_operand.hbm [shape: f32[128,128], index: 6, kind: output, shape index: {}]  }
   0x1   :  { %v912_v0 = vld [vmem:[%s1196_s4 + $0x38] sm:$0xff]   ;;  %v913_v1 = vld [vmem:[%s1196_s4 + $0x30] sm:$0xff]   ;;  %910 = vset.pattern.permute.xlu0 %v958_v2  ;;  %911 = vset.pattern.permute.xlu1 %v958_v2  ;;  %v914_v3 = vld [vmem:[%s1196_s4 + $0x28] sm:$0xff]  }
   0x2   :  { %842 = vmatprep.subr.bf16.mxu0 %v912_v0  ;;  %v915_v4 = vld [vmem:[%s1196_s4 + $0x20] sm:$0xff]   ;;  %v916_v6 = vld [vmem:[%s1196_s4 + $0x18] sm:$0xff]   ;;  %v917_v7 = vld [vmem:[%s1196_s4 + $0x10] sm:$0xff]  }
   0x3   :  { %843 = vmatpush3.bf16.msra.mxu0 %v912_v0  ;;  %v920_v5 = vld [vmem:[%s1195_s3] sm:$0xff]   ;;  %v284_v8 = vld [vmem:[%s1194_s2 + $0x70] sm:$0xff]  ;;  %v285_v10 = vld [vmem:[%s1194_s2 + $0x78] sm:$0xff] }
   0x4   :  { %844 = vmatprep.subr.bf16.mxu0 %v913_v1  ;;  %858 = vmatprep.mubr.bf16.mxu0 %v920_v5  ;;  %v282_v9 = vld [vmem:[%s1194_s2 + $0x60] sm:$0xff]  ;;  %v283_v11 = vld [vmem:[%s1194_s2 + $0x68] sm:$0xff]  ;;  %v280_v13 = vld [vmem:[%s1194_s2 + $0x50] sm:$0xff] }
   0x5   :  { %358 = vperm.xlu0 %910, %v284_v8   ;;  %348 = vperm.xlu1 %911, %v282_v9   ;;  %v918_v12 = vld [vmem:[%s1196_s4 + $0x8] sm:$0xff]   ;;  %v281_v14 = vld [vmem:[%s1194_s2 + $0x58] sm:$0xff]  ;;  %v919_v15 = vld [vmem:[%s1196_s4] sm:$0xff]  }
   0x6   :  { %v278_v16 = vld [vmem:[%s1194_s2 + $0x40] sm:$0xff]  ;;  %v279_v17 = vld [vmem:[%s1194_s2 + $0x48] sm:$0xff]  ;;  %v276_v19 = vld [vmem:[%s1194_s2 + $0x30] sm:$0xff] }
   0x7   :  { %845 = vmatpush3.bf16.msra.mxu0 %v913_v1  ;;  %v921_v18 = vld [vmem:[%s1195_s3 + $0x8] sm:$0xff]   ;;  %v277_v20 = vld [vmem:[%s1194_s2 + $0x38] sm:$0xff]  ;;  %v922_v21 = vld [vmem:[%s1195_s3 + $0x10] sm:$0xff]  }
   0x8   :  { %846 = vmatprep.subr.bf16.mxu0 %v914_v3 }
   0x9   :  { %363 = vperm.xlu0 %910, %v285_v10   ;;  %353 = vperm.xlu1 %911, %v283_v11  }
   0xb   :  { %847 = vmatpush3.bf16.msra.mxu0 %v914_v3 }
   0xc   :  { %848 = vmatprep.subr.bf16.mxu0 %v915_v4 }
   0xd   :  { %338 = vperm.xlu0 %910, %v280_v13   ;;  %343 = vperm.xlu1 %911, %v281_v14  }
   0xf   :  { %849 = vmatpush3.bf16.msra.mxu0 %v915_v4 }
  0x10   :  { %850 = vmatprep.subr.bf16.mxu0 %v916_v6 }
  0x11   :  { %328 = vperm.xlu0 %910, %v278_v16   ;;  %333 = vperm.xlu1 %911, %v279_v17  }
  0x13   :  { %851 = vmatpush3.bf16.msra.mxu0 %v916_v6 }
  0x14   :  { %852 = vmatprep.subr.bf16.mxu0 %v917_v7 }
  0x17   :  { %853 = vmatpush3.bf16.msra.mxu0 %v917_v7 }
  0x18   :  { %854 = vmatprep.subr.bf16.mxu0 %v918_v12 }
  0x1b   :  { %855 = vmatpush3.bf16.msra.mxu0 %v918_v12 }
  0x1c   :  { %856 = vmatprep.subr.bf16.mxu0 %v919_v15 }
  0x1f   :  { %857 = vmatpush3.bf16.msra.mxu0 %v919_v15 }
  0x20   :  { %11 = vsyncpa [#allocation4], 0  ;;  %318 = vperm.xlu0 %910, %v276_v19   ;;  %323 = vperm.xlu1 %911, %v277_v20   ;;  %v274_v22 = vld [vmem:[%s1194_s2 + $0x20] sm:$0xff]  ;;  %v275_v23 = vld [vmem:[%s1194_s2 + $0x28] sm:$0xff] }
  0x21   :  { %v923_v24 = vld [vmem:[%s1195_s3 + $0x18] sm:$0xff]   ;;  %v272_v25 = vld [vmem:[%s1194_s2 + $0x10] sm:$0xff]  ;;  %v924_v27 = vld [vmem:[%s1195_s3 + $0x20] sm:$0xff]  }
  0x22   :  { %859 = vmatmul.mubr.bf16.vlgmr.msra.gmra.mxu0 %v921_v18  ;;  %v273_v26 = vld [vmem:[%s1194_s2 + $0x18] sm:$0xff]  ;;  %v270_v28 = vld [vmem:[%s1194_s2] sm:$0xff]  ;;  %v271_v29 = vld [vmem:[%s1194_s2 + $0x8] sm:$0xff] }
  0x23   :  { %862 = vmatprep.mubr.bf16.mxu0 %v922_v21  ;;  %v925_v30 = vld [vmem:[%s1195_s3 + $0x28] sm:$0xff]   ;;  %v602_v31 = vld [vmem:[%s1193_s1] sm:$0xff]  ;;  %v926_v33 = vld [vmem:[%s1195_s3 + $0x30] sm:$0xff]  }
  0x24   :  { %308 = vperm.xlu0 %910, %v274_v22   ;;  %313 = vperm.xlu1 %911, %v275_v23   ;;  %v603_v32 = vld [vmem:[%s1193_s1 + $0x8] sm:$0xff]  ;;  %v604_v34 = vld [vmem:[%s1193_s1 + $0x10] sm:$0xff]  ;;  %v605_v35 = vld [vmem:[%s1193_s1 + $0x18] sm:$0xff] }
  0x25   :  { %v927_v36 = vld [vmem:[%s1195_s3 + $0x38] sm:$0xff]   ;;  %v606_v37 = vld [vmem:[%s1193_s1 + $0x20] sm:$0xff]  ;;  %v607_v38 = vld [vmem:[%s1193_s1 + $0x28] sm:$0xff] }
  0x26   :  { %v608_v39 = vld [vmem:[%s1193_s1 + $0x30] sm:$0xff]  ;;  %v609_v40 = vld [vmem:[%s1193_s1 + $0x38] sm:$0xff]  ;;  %v610_v41 = vld [vmem:[%s1193_s1 + $0x40] sm:$0xff] }
  0x27   :  { %v611_v42 = vld [vmem:[%s1193_s1 + $0x48] sm:$0xff]  ;;  %v612_v43 = vld [vmem:[%s1193_s1 + $0x50] sm:$0xff]  ;;  %v613_v44 = vld [vmem:[%s1193_s1 + $0x58] sm:$0xff] }
  0x28   :  { %298 = vperm.xlu0 %910, %v272_v25   ;;  %303 = vperm.xlu1 %911, %v273_v26   ;;  %v614_v45 = vld [vmem:[%s1193_s1 + $0x60] sm:$0xff]  ;;  %v615_v46 = vld [vmem:[%s1193_s1 + $0x68] sm:$0xff]  ;;  %v616_v47 = vld [vmem:[%s1193_s1 + $0x70] sm:$0xff] }
  0x29   :  { %v617_v48 = vld [vmem:[%s1193_s1 + $0x78] sm:$0xff]  ;;  %v928_v49 = vld [vmem:[%s1192_s0] sm:$0xff]  }
  0x2a   :  { %863 = vmatmul.mubr.bf16.gmra.mxu0 %v923_v24  ;;  %890 = vmatprep.mubr.bf16.mxu1 %v928_v49 }
  0x2b   :  { %866 = vmatprep.mubr.bf16.mxu0 %v924_v27 }
  0x2c   :  { %288 = vperm.xlu0 %910, %v270_v28   ;;  %293 = vperm.xlu1 %911, %v271_v29  }
  0x30   :  { %636 = vperm.xlu0 %910, %v602_v31   ;;  %641 = vperm.xlu1 %911, %v603_v32  }
  0x32   :  { %867 = vmatmul.mubr.bf16.gmra.mxu0 %v925_v30 }
  0x33   :  { %870 = vmatprep.mubr.bf16.mxu0 %v926_v33 }
  0x34   :  { %646 = vperm.xlu0 %910, %v604_v34   ;;  %651 = vperm.xlu1 %911, %v605_v35  }
  0x38   :  { %656 = vperm.xlu0 %910, %v606_v37   ;;  %661 = vperm.xlu1 %911, %v607_v38  }
  0x3a   :  { %871 = vmatmul.mubr.bf16.gmra.mxu0 %v927_v36 }
  0x3c   :  { %666 = vperm.xlu0 %910, %v608_v39   ;;  %671 = vperm.xlu1 %911, %v609_v40  }
  0x40   :  { %676 = vperm.xlu0 %910, %v610_v41   ;;  %681 = vperm.xlu1 %911, %v611_v42   ;;  %v929_v42 = vld [vmem:[%s1192_s0 + $0x8] sm:$0xff]  }
  0x44   :  { %686 = vperm.xlu0 %910, %v612_v43   ;;  %691 = vperm.xlu1 %911, %v613_v44   ;;  %v930_v43 = vld [vmem:[%s1192_s0 + $0x10] sm:$0xff]   ;;  %v931_v44 = vld [vmem:[%s1192_s0 + $0x18] sm:$0xff]  }
  0x48   :  { %696 = vperm.xlu0 %910, %v614_v45   ;;  %701 = vperm.xlu1 %911, %v615_v46   ;;  %v932_v45 = vld [vmem:[%s1192_s0 + $0x20] sm:$0xff]   ;;  %v933_v46 = vld [vmem:[%s1192_s0 + $0x28] sm:$0xff]  }
  0x4c   :  { %706 = vperm.xlu0 %910, %v616_v47   ;;  %711 = vperm.xlu1 %911, %v617_v48   ;;  %v934_v47 = vld [vmem:[%s1192_s0 + $0x30] sm:$0xff]   ;;  %v935_v48 = vld [vmem:[%s1192_s0 + $0x38] sm:$0xff]   ;;  %s959_s0 = smov [#allocation3]  }
  0x80   :  { %v349_v55 = vpop.permute.xlu1 %348  ;;  %v359_v57 = vpop.permute.xlu0 %358 }
  0x84   :  { %v354_v60 = vpop.permute.xlu1 %353  ;;  %v364_v62 = vpop.permute.xlu0 %363 }
  0x88   :  { %v344_v1 = vpop.permute.xlu1 %343  ;;  %v339_v3 = vpop.permute.xlu0 %338 }
  0x8c   :  { %v334_v6 = vpop.permute.xlu1 %333  ;;  %v329_v10 = vpop.permute.xlu0 %328 }
  0x9b   :  { %v324_v17 = vpop.permute.xlu1 %323  ;;  %v319_v19 = vpop.permute.xlu0 %318 }
  0x9f   :  { %v314_v23 = vpop.permute.xlu1 %313  ;;  %v309_v26 = vpop.permute.xlu0 %308 }
  0xa3   :  { %v304_v30 = vpop.permute.xlu1 %303  ;;  %v299_v32 = vpop.permute.xlu0 %298 }
  0xa7   :  { %v294_v36 = vpop.permute.xlu1 %293  ;;  %v289_v39 = vpop.permute.xlu0 %288 }
  0xab   :  { %v637_v49 = vpop.permute.xlu0 %636 }
  0xe2   :  { %v860_v50 = vpop.f32.mrf.mxu0 }
  0xe3   :  { %v368_v35 = vmul.f32 %v860_v50, %v299_v32  ;;  %v642_v50 = vpop.permute.xlu1 %641 }
  0xe4   :  { %v1144_v51 = vpop.f32.mrf.mxu0 }
  0xe5   :  { %v366_v40 = vmul.f32 %v289_v39, %v1144_v51  ;;  %v647_v51 = vpop.permute.xlu0 %646 }
  0xe6   :  { %v861_v52 = vpop.f32.mrf.mxu0 }
  0xe7   :  { %v369_v33 = vmul.f32 %v861_v52, %v304_v30  ;;  %v652_v52 = vpop.permute.xlu1 %651 }
  0xe8   :  { %v210_v53 = vpop.f32.mrf.mxu0 }
  0xe9   :  { %v383_v37 = vpack.c.bf16 %v369_v33, %v368_v35  ;;  %v367_v38 = vmul.f32 %v294_v36, %v210_v53  ;;  %v657_v53 = vpop.permute.xlu0 %656 }
  0xea   :  { %v864_v54 = vpop.f32.mrf.mxu0 }
  0xeb   :  { %v372_v27 = vmul.f32 %v864_v54, %v319_v19  ;;  %v382_v41 = vpack.c.bf16 %v367_v38, %v366_v40  ;;  %v662_v54 = vpop.permute.xlu1 %661 }
  0xec   :  { %v223_v56 = vpop.f32.mrf.mxu0 }
  0xed   :  { %v370_v31 = vmul.f32 %v309_v26, %v223_v56 }
  0xee   :  { %v865_v58 = vpop.f32.mrf.mxu0 }
  0xef   :  { %v373_v24 = vmul.f32 %v865_v58, %v324_v17 }
  0xf0   :  { %v226_v59 = vpop.f32.mrf.mxu0 }
  0xf1   :  { %v385_v28 = vpack.c.bf16 %v373_v24, %v372_v27  ;;  %v371_v29 = vmul.f32 %v314_v23, %v226_v59 }
  0xf2   :  { %v868_v61 = vpop.f32.mrf.mxu0 }
  0xf3   :  { %v376_v18 = vmul.f32 %v868_v61, %v339_v3  ;;  %v384_v34 = vpack.c.bf16 %v371_v29, %v370_v31 }
  0xf4   :  { %v239_v63 = vpop.f32.mrf.mxu0 }
  0xf5   :  { %v374_v22 = vmul.f32 %v329_v10, %v239_v63 }
  0xf6   :  { %v869_v0 = vpop.f32.mrf.mxu0 }
  0xf7   :  { %v377_v15 = vmul.f32 %v869_v0, %v344_v1 }
  0xf8   :  { %v242_v2 = vpop.f32.mrf.mxu0 }
  0xf9   :  { %v387_v20 = vpack.c.bf16 %v377_v15, %v376_v18  ;;  %v375_v21 = vmul.f32 %v334_v6, %v242_v2 }
  0xfa   :  { %v872_v4 = vpop.f32.mrf.mxu0 }
  0xfb   :  { %v380_v8 = vmul.f32 %v872_v4, %v359_v57  ;;  %v386_v25 = vpack.c.bf16 %v375_v21, %v374_v22  ;;  %v1171_v57 = vld [vmem:[%s1197_s5] ss:$0 sm:$0xff]  ;;  %s774_s5 = sshll.u32 %s959_s0, 4  ;;  %s775_s5 = int_to_ptr.vmem [resolvable:$true] %s774_s5 }
  0xfc   :  { %v255_v5 = vpop.f32.mrf.mxu0  ;;  %s936_s7 = scalar_lea.vmem %s775_s5, 2048  ;;  %p941_p1 = scmp.lt.s32.totalorder %s775_s5, %s775_s5 }
  0xfd   :  { %v378_v12 = vmul.f32 %v349_v55, %v255_v5  ;;  %v667_v55 = vpop.permute.xlu0 %666  ;;  %p937_p0 = scmp.ne.s32.totalorder %s775_s5, %s936_s7  ;;  %p942_p2 = scmp.lt.s32.totalorder %s936_s7, %s936_s7 }
  0xfe   :  { %v873_v7 = vpop.f32.mrf.mxu0 }
  0xff   :  { %v381_v9 = vmul.f32 %v873_v7, %v364_v62  ;;  %v672_v62 = vpop.permute.xlu1 %671  ;;  %p943_p3 = por %p942_p2, %p941_p1 }
 0x100   :  { %v258_v11 = vpop.f32.mrf.mxu0 }
 0x101   :  { %v379_v13 = vmul.f32 %v354_v60, %v258_v11  ;;  %v389_v14 = vpack.c.bf16 %v381_v9, %v380_v8  ;;  %v677_v2 = vpop.permute.xlu0 %676  ;;  %p944_p4 = pnand %p943_p3, %p937_p0 }
 0x103   :  { %v388_v16 = vpack.c.bf16 %v379_v13, %v378_v12  ;;  %874 = vmatprep.subr.bf16.mxu1 %v389_v14  ;;  %v682_v9 = vpop.permute.xlu1 %681 }
 0x104   :  { %875 = vmatpush3.bf16.msra.mxu1 %v389_v14 }
 0x105   :  { %876 = vmatprep.subr.bf16.mxu1 %v388_v16  ;;  %v687_v13 = vpop.permute.xlu0 %686 }
 0x108   :  { %877 = vmatpush3.bf16.msra.mxu1 %v388_v16 }
 0x109   :  { %878 = vmatprep.subr.bf16.mxu1 %v387_v20  ;;  %v697_v24 = vpop.permute.xlu0 %696 }
 0x10c   :  { %879 = vmatpush3.bf16.msra.mxu1 %v387_v20  ;;  %v692_v20 = vpop.permute.xlu1 %691 }
 0x10d   :  { %880 = vmatprep.subr.bf16.mxu1 %v386_v25  ;;  %v707_v35 = vpop.permute.xlu0 %706 }
 0x110   :  { %881 = vmatpush3.bf16.msra.mxu1 %v386_v25  ;;  %v702_v31 = vpop.permute.xlu1 %701 }
 0x111   :  { %882 = vmatprep.subr.bf16.mxu1 %v385_v28 }
 0x114   :  { %883 = vmatpush3.bf16.msra.mxu1 %v385_v28 }
 0x115   :  { %884 = vmatprep.subr.bf16.mxu1 %v384_v34 }
 0x118   :  { %885 = vmatpush3.bf16.msra.mxu1 %v384_v34 }
 0x119   :  { %886 = vmatprep.subr.bf16.mxu1 %v383_v37 }
 0x11c   :  { %887 = vmatpush3.bf16.msra.mxu1 %v383_v37 }
 0x11d   :  { %888 = vmatprep.subr.bf16.mxu1 %v382_v41 }
 0x120   :  { %889 = vmatpush3.bf16.msra.mxu1 %v382_v41 }
 0x123   :  { %891 = vmatmul.mubr.bf16.vlgmr.msra.gmra.mxu1 %v929_v42  ;;  %v712_v42 = vpop.permute.xlu1 %711 }
 0x124   :  { %894 = vmatprep.mubr.bf16.mxu1 %v930_v43 }
 0x12b   :  { %895 = vmatmul.mubr.bf16.gmra.mxu1 %v931_v44 }
 0x12c   :  { %898 = vmatprep.mubr.bf16.mxu1 %v932_v45 }
 0x133   :  { %899 = vmatmul.mubr.bf16.gmra.mxu1 %v933_v46 }
 0x134   :  { %902 = vmatprep.mubr.bf16.mxu1 %v934_v47 }
 0x13b   :  { %903 = vmatmul.mubr.bf16.gmra.mxu1 %v935_v48 }
 0x1e3   :  { %v892_v56 = vpop.f32.mrf.mxu1 }
 0x1e4   :  { %v716_v58 = vmul.f32 %v892_v56, %v647_v51 }
 0x1e5   :  { %v504_v59 = vpop.f32.mrf.mxu1 }
 0x1e6   :  { %v739_v60 = vadd.f32 %v1171_v57, %v716_v58  ;;  %v714_v61 = vmul.f32 %v637_v49, %v504_v59 }
 0x1e7   :  { %v893_v63 = vpop.f32.mrf.mxu1 }
 0x1e8   :  { %755 = vst [vmem:[#allocation3 + $0x10] sm:$0xff] %v739_v60  ;;  %v737_v0 = vadd.f32 %v1171_v57, %v714_v61  ;;  %v717_v1 = vmul.f32 %v893_v63, %v652_v52 }
 0x1e9   :  { %v507_v3 = vpop.f32.mrf.mxu1 }
 0x1ea   :  { %753 = vst [vmem:[#allocation3] sm:$0xff] %v737_v0  ;;  %v740_v4 = vadd.f32 %v1171_v57, %v717_v1  ;;  %v715_v5 = vmul.f32 %v642_v50, %v507_v3 }
 0x1eb   :  { %v896_v6 = vpop.f32.mrf.mxu1 }
 0x1ec   :  { %756 = vst [vmem:[#allocation3 + $0x18] sm:$0xff] %v740_v4  ;;  %v738_v7 = vadd.f32 %v1171_v57, %v715_v5  ;;  %v720_v8 = vmul.f32 %v896_v6, %v667_v55 }
 0x1ed   :  { %v520_v10 = vpop.f32.mrf.mxu1 }
 0x1ee   :  { %754 = vst [vmem:[#allocation3 + $0x8] sm:$0xff] %v738_v7  ;;  %v743_v11 = vadd.f32 %v1171_v57, %v720_v8  ;;  %v718_v12 = vmul.f32 %v657_v53, %v520_v10 }
 0x1ef   :  { %v897_v14 = vpop.f32.mrf.mxu1 }
 0x1f0   :  { %759 = vst [vmem:[#allocation3 + $0x30] sm:$0xff] %v743_v11  ;;  %v741_v15 = vadd.f32 %v1171_v57, %v718_v12  ;;  %v721_v16 = vmul.f32 %v897_v14, %v672_v62 }
 0x1f1   :  { %v523_v17 = vpop.f32.mrf.mxu1 }
 0x1f2   :  { %757 = vst [vmem:[#allocation3 + $0x20] sm:$0xff] %v741_v15  ;;  %v744_v18 = vadd.f32 %v1171_v57, %v721_v16  ;;  %v719_v19 = vmul.f32 %v662_v54, %v523_v17 }
 0x1f3   :  { %v900_v21 = vpop.f32.mrf.mxu1 }
 0x1f4   :  { %760 = vst [vmem:[#allocation3 + $0x38] sm:$0xff] %v744_v18  ;;  %v742_v22 = vadd.f32 %v1171_v57, %v719_v19  ;;  %v724_v23 = vmul.f32 %v900_v21, %v687_v13 }
 0x1f5   :  { %v536_v25 = vpop.f32.mrf.mxu1 }
 0x1f6   :  { %758 = vst [vmem:[#allocation3 + $0x28] sm:$0xff] %v742_v22  ;;  %v747_v26 = vadd.f32 %v1171_v57, %v724_v23  ;;  %v722_v27 = vmul.f32 %v677_v2, %v536_v25 }
 0x1f7   :  { %v901_v28 = vpop.f32.mrf.mxu1 }
 0x1f8   :  { %763 = vst [vmem:[#allocation3 + $0x50] sm:$0xff] %v747_v26  ;;  %v745_v29 = vadd.f32 %v1171_v57, %v722_v27  ;;  %v725_v30 = vmul.f32 %v901_v28, %v692_v20 }
 0x1f9   :  { %v539_v32 = vpop.f32.mrf.mxu1 }
 0x1fa   :  { %761 = vst [vmem:[#allocation3 + $0x40] sm:$0xff] %v745_v29  ;;  %v748_v33 = vadd.f32 %v1171_v57, %v725_v30  ;;  %v723_v34 = vmul.f32 %v682_v9, %v539_v32 }
 0x1fb   :  { %v904_v36 = vpop.f32.mrf.mxu1 }
 0x1fc   :  { %764 = vst [vmem:[#allocation3 + $0x58] sm:$0xff] %v748_v33  ;;  %v746_v37 = vadd.f32 %v1171_v57, %v723_v34  ;;  %v728_v38 = vmul.f32 %v904_v36, %v707_v35 }
 0x1fd   :  { %v552_v39 = vpop.f32.mrf.mxu1 }
 0x1fe   :  { %762 = vst [vmem:[#allocation3 + $0x48] sm:$0xff] %v746_v37  ;;  %v751_v40 = vadd.f32 %v1171_v57, %v728_v38  ;;  %v726_v41 = vmul.f32 %v697_v24, %v552_v39 }
 0x1ff   :  { %v905_v43 = vpop.f32.mrf.mxu1 }
 0x200   :  { %767 = vst [vmem:[#allocation3 + $0x70] sm:$0xff] %v751_v40  ;;  %v749_v44 = vadd.f32 %v1171_v57, %v726_v41  ;;  %v729_v45 = vmul.f32 %v905_v43, %v712_v42 }
 0x201   :  { %v555_v46 = vpop.f32.mrf.mxu1 }
 0x202   :  { %765 = vst [vmem:[#allocation3 + $0x60] sm:$0xff] %v749_v44  ;;  %v752_v47 = vadd.f32 %v1171_v57, %v729_v45  ;;  %v727_v48 = vmul.f32 %v702_v31, %v555_v46 }
 0x204   :  { %768 = vst [vmem:[#allocation3 + $0x78] sm:$0xff] %v752_v47  ;;  %v750_v49 = vadd.f32 %v1171_v57, %v727_v48 }
 0x206   :  { %766 = vst [vmem:[#allocation3 + $0x68] sm:$0xff] %v750_v49 }
 0x207   :  { %947 = shalt.err (!%p944_p4)
}
 0x208   :  { %s960_s8 = smov 128   ;;  %s961_s9 = smov 8  }
 0x209   :  { %780 = dma.vmem_to_hbm [thread:$0]  %s775_s5, 2048, %s1198_s6, [#allocation4], %s960_s8, %s960_s8, %s961_s9  }
 0x20a   :  { %956 = dma.done.wait [#allocation4], 2048  }
 0x20b   :  { %957 = vsyncadd [#allocation4], 4294965248 }
 0x20c   :  { %784 = vsyncpa [#allocation4], 1 }

</bundles_post_ra>
